<compile_context>
chip_gen: v5e
topology: v5e:2x2
jax: 0.10.0
libtpu: 0.0.40
codegen_flags: <defaults>
</compile_context>

<pallas_src>
import functools
import math

import jax
import jax.numpy as jnp
from jax import lax
from jax.experimental import pallas as pl
from jax.experimental.pallas import tpu as pltpu

EPS = 1e-5


def _round_up(x, m):
    return ((x + m - 1) // m) * m


def _padded_bytes(shape, itemsize=4):
    """Bytes of a VMEM buffer after (sublane, lane) padding to (8, 128)."""
    if not shape:
        return itemsize
    s = list(shape)
    s[-1] = _round_up(s[-1], 128)
    if len(s) >= 2:
        s[-2] = _round_up(s[-2], 8)
    return int(math.prod(s)) * itemsize


# ---------------------------------------------------------------------------
# Fused StemNet kernel: one grid step == one image, everything channel-major
#   g_ref : (1, K, M1)  folded input frame   (K = 16*Cin features, M1 = Hf*Wf frame positions)
#   o_ref : (1, E, M2)  conv3 output frame   (M2 = Ho*Wf)
# ---------------------------------------------------------------------------
def _stem_kernel(g_ref, w1_ref, w2_ref, w3_ref, m1_ref,
                 s1_ref, b1_ref, s2_ref, b2_ref, s3_ref, b3_ref,
                 o_ref, *, Wf, M2):
    # ---- conv1: single MXU matmul over the folded (2x2 neighborhood x phase x Cin) features ----
    y1 = jnp.dot(w1_ref[...], g_ref[0], preferred_element_type=jnp.float32)   # (E, M1)
    y1 = jnp.maximum(y1 * s1_ref[...] + b1_ref[...], 0.0)                     # BN1 + ReLU
    y1 = y1 * m1_ref[...]                            # zero the frame border in ONE VPU multiply

    # ---- conv2: depthwise 3x3 (stride 1, pad 1); taps are static lane-offset slices ----
    w2 = w2_ref[...]                                                          # (9, E, 1)
    acc = y1[:, 0:M2] * w2[0]
    for k in range(1, 9):
        kh, kw = divmod(k, 3)
        off = kh * Wf + kw
        acc = acc + y1[:, off:off + M2] * w2[k]
    y2 = jnp.maximum(acc * s2_ref[...] + b2_ref[...], 0.0)                    # (E, M2)

    # ---- conv3: 1x1 conv = (E,E) @ (E,M2) channel-major matmul; output is lane-dense NCHW ----
    y3 = jnp.dot(w3_ref[...], y2, preferred_element_type=jnp.float32)         # (E, M2)
    y3 = jnp.maximum(y3 * s3_ref[...] + b3_ref[...], 0.0)
    o_ref[0] = y3.astype(o_ref.dtype)


# ---------------------------------------------------------------------------
# Wrapper-side preparation (cheap: touches only the Cin-channel input and the tiny weights)
# ---------------------------------------------------------------------------
def _fold_bn(gamma, beta, mean, var):
    scale = gamma / jnp.sqrt(var + EPS)
    bias = beta - mean * scale
    return scale, bias


def _fold_conv1_weights(w1):
    """(E, Cin, 3, 3) -> (E, 16*Cin), feature order (dh, dw, ph, pw, c); kh=3 / kw=3 taps zero."""
    E, Cin = w1.shape[0], w1.shape[1]
    wp = jnp.pad(w1, ((0, 0), (0, 0), (0, 1), (0, 1)))            # (E, Cin, 4, 4)
    wp = wp.reshape(E, Cin, 2, 2, 2, 2)                           # (e, c, dh, ph, dw, pw)
    wp = jnp.transpose(wp, (0, 2, 4, 3, 5, 1))                    # (e, dh, dw, ph, pw, c)
    return wp.reshape(E, 16 * Cin)


def _build_input_frame(x, Ho, Wo, Hf, Wf):
    """NCHW input -> channel-major folded im2col frame (N, 16*Cin, Hf*Wf)."""
    N, Cin, H, W = x.shape
    Hs, Ws = Ho + 1, Wo + 1
    # pad=1 on top/left (conv1 padding) + enough bottom/right zeros for an even phase split
    xp = jnp.pad(x, ((0, 0), (0, 0), (1, 2 * Hs - H - 1), (1, 2 * Ws - W - 1)))
    xph = xp.reshape(N, Cin, Hs, 2, Ws, 2)                        # (n, c, hs, ph, ws, pw)
    xph = jnp.transpose(xph, (0, 2, 4, 3, 5, 1))                  # (n, hs, ws, ph, pw, c)
    # 2x2 im2col of the phase-split frame: fold the (dh, dw) neighborhood into the feature dim
    nbr = [xph[:, dh:dh + Ho, dw:dw + Wo] for dh in (0, 1) for dw in (0, 1)]
    g = jnp.stack(nbr, axis=3).reshape(N, Ho, Wo, 16 * Cin)       # (n, a, b, K)
    # drop into the zero-bordered y1 frame and go channel-major (spatial flattened into lanes)
    g = jnp.pad(g, ((0, 0), (1, Hf - Ho - 1), (1, Wf - Wo - 1), (0, 0)))
    return jnp.transpose(g, (0, 3, 1, 2)).reshape(N, 16 * Cin, Hf * Wf)


def _frame_mask(Ho, Wo, Hf, Wf):
    m = jnp.pad(jnp.ones((Ho, Wo), jnp.float32), ((1, Hf - Ho - 1), (1, Wf - Wo - 1)))
    return m.reshape(1, Hf * Wf)


# ---------------------------------------------------------------------------
# StemNet forward (NCHW in -> NCHW out, like the PyTorch module)
# ---------------------------------------------------------------------------
@jax.jit
def stemnet_forward(x, params):
    (w1, bn1), (w2, bn2), (w3, bn3) = params
    N, Cin, H, W = x.shape
    E = w1.shape[0]

    # PyTorch conv semantics: out = floor((in + 2*pad - k)/stride) + 1  (handles odd H/W)
    Ho = (H - 1) // 2 + 1
    Wo = (W - 1) // 2 + 1

    # y1 frame geometry: 1 left border col, >=1 right border col, 1 top + 2 bottom border rows so
    # every depthwise tap slice [off, off + M2) stays inside the frame (off <= 2*Wf + 2).
    Wf = _round_up(Wo + 2, 8)
    Hf = Ho + 3
    M1 = Hf * Wf                       # y1 frame positions
    M2 = Ho * Wf                       # output frame positions (cols >= Wo are discarded)
    K = 16 * Cin                       # folded conv1 feature depth

    s1, b1 = _fold_bn(*bn1)
    s2, b2 = _fold_bn(*bn2)
    s3, b3 = _fold_bn(*bn3)

    g = _build_input_frame(x, Ho, Wo, Hf, Wf)                     # (N, K, M1)
    w1c = _fold_conv1_weights(w1)                                 # (E, K)
    w2t = jnp.transpose(w2[:, 0].reshape(E, 9), (1, 0)).reshape(9, E, 1)
    w3m = w3[:, :, 0, 0]                                          # (E, E)
    m1 = _frame_mask(Ho, Wo, Hf, Wf)                              # (1, M1)

    kernel = functools.partial(_stem_kernel, Wf=Wf, M2=M2)

    def _const(shape):
        r = len(shape)
        return pl.BlockSpec(shape, lambda n, _r=r: (0,) * _r)     # resident, fetched once

    # VMEM limit sized from the actual padded footprint (double-buffered blocks + live values).
    blocks = [(1, K, M1), (1, E, M2), (E, K), (9, E, 1), (E, E), (1, M1)] + [(E, 1)] * 6
    live = [(E, M1)] + [(E, M2)] * 3
    vmem_bytes = 2 * sum(_padded_bytes(s) for s in blocks) + sum(_padded_bytes(s) for s in live)
    vmem_limit = int(min(64 * 1024 * 1024, vmem_bytes + 16 * 1024 * 1024))

    out = pl.pallas_call(
        kernel,
        out_shape=jax.ShapeDtypeStruct((N, E, M2), x.dtype),
        grid=(N,),
        in_specs=[
            pl.BlockSpec((1, K, M1), lambda n: (n, 0, 0)),        # per-image folded input frame
            _const((E, K)),                                       # conv1 folded weights
            _const((9, E, 1)),                                    # depthwise 3x3 taps
            _const((E, E)),                                       # 1x1 conv weights
            _const((1, M1)),                                      # frame validity mask
            _const((E, 1)), _const((E, 1)),                       # BN1 scale / bias
            _const((E, 1)), _const((E, 1)),                       # BN2 scale / bias
            _const((E, 1)), _const((E, 1)),                       # BN3 scale / bias
        ],
        out_specs=pl.BlockSpec((1, E, M2), lambda n: (n, 0, 0)),  # NCHW, lane-dense last dim
        compiler_params=pltpu.CompilerParams(
            dimension_semantics=("parallel",),                    # megacore sharding across images
            vmem_limit_bytes=vmem_limit,
        ),
    )(g, w1c, w2t, w3m, m1,
      s1.reshape(E, 1), b1.reshape(E, 1),
      s2.reshape(E, 1), b2.reshape(E, 1),
      s3.reshape(E, 1), b3.reshape(E, 1))

    # (N, E, Ho*Wf) -> NCHW; one strided slice drops the Wf-Wo frame padding columns.
    return out.reshape(N, E, Ho, Wf)[:, :, :, :Wo]


# ---------------------------------------------------------------------------
# Pure-JAX reference (lax conv) for verification
# ---------------------------------------------------------------------------
def reference_forward(x, params):
    def block(x, w, bn, stride, pad, groups):
        y = lax.conv_general_dilated(
            x, w, (stride, stride), [(pad, pad), (pad, pad)],
            dimension_numbers=('NCHW', 'OIHW', 'NCHW'),
            feature_group_count=groups)
        gamma, beta, mean, var = bn
        scale = gamma / jnp.sqrt(var + EPS)
        bias = beta - mean * scale
        y = y * scale[None, :, None, None] + bias[None, :, None, None]
        return jnp.maximum(y, 0.0)

    (w1, bn1), (w2, bn2), (w3, bn3) = params
    E = w1.shape[0]
    x = block(x, w1, bn1, 2, 1, 1)
    x = block(x, w2, bn2, 1, 1, E)
    x = block(x, w3, bn3, 1, 0, 1)
    return x


# ---------------------------------------------------------------------------
# Deterministic parameter construction (shapes match nn.Module.__init__)
# ---------------------------------------------------------------------------
def make_params(key, in_channels, embed_dim):
    def bn_params(k, c):
        kg, kb, km, kv = jax.random.split(k, 4)
        gamma = jax.random.uniform(kg, (c,), jnp.float32, 0.5, 1.5)
        beta = jax.random.normal(kb, (c,), jnp.float32) * 0.1
        mean = jax.random.normal(km, (c,), jnp.float32) * 0.1
        var = jax.random.uniform(kv, (c,), jnp.float32, 0.5, 1.5)
        return (gamma, beta, mean, var)

    k1, k2, k3, kb1, kb2, kb3 = jax.random.split(key, 6)
    w1 = jax.random.normal(k1, (embed_dim, in_channels, 3, 3), jnp.float32) * 0.1
    w2 = jax.random.normal(k2, (embed_dim, 1, 3, 3), jnp.float32) * 0.1    # depthwise
    w3 = jax.random.normal(k3, (embed_dim, embed_dim, 1, 1), jnp.float32) * 0.1
    return ((w1, bn_params(kb1, embed_dim)),
            (w2, bn_params(kb2, embed_dim)),
            (w3, bn_params(kb3, embed_dim)))


if __name__ == "__main__":
    key = jax.random.PRNGKey(0)
    kx, kp, kx2 = jax.random.split(key, 3)

    in_channels, embed_dim = 4, 32
    x = jax.random.normal(kx, (2, in_channels, 16, 16), jnp.float32)   # NCHW like PyTorch
    params = make_params(kp, in_channels, embed_dim)

    out = jax.block_until_ready(stemnet_forward(x, params))
    ref = jax.block_until_ready(reference_forward(x, params))
    assert out.shape == (2, embed_dim, 8, 8), out.shape
    assert jnp.allclose(out, ref, rtol=1e-3, atol=1e-4), float(jnp.abs(out - ref).max())

    # Odd spatial size: exercises the PyTorch ceil-style output shape.
    x_odd = jax.random.normal(kx2, (1, in_channels, 9, 11), jnp.float32)
    out_odd = jax.block_until_ready(stemnet_forward(x_odd, params))
    ref_odd = jax.block_until_ready(reference_forward(x_odd, params))
    assert out_odd.shape == ref_odd.shape == (1, embed_dim, 5, 6), out_odd.shape
    assert jnp.allclose(out_odd, ref_odd, rtol=1e-3, atol=1e-4), float(jnp.abs(out_odd - ref_odd).max())

    print("KERNEL_OK")
</pallas_src>

<mosaic_0001>
module attributes {stable_mosaic.version = 11 : i64} {
  func.func @_stem_kernel(%arg0: i32, %arg1: memref<1x64x176xf32, #tpu.memory_space<vmem>>, %arg2: memref<32x64xf32, #tpu.memory_space<vmem>>, %arg3: memref<9x32x1xf32, #tpu.memory_space<vmem>>, %arg4: memref<32x32xf32, #tpu.memory_space<vmem>>, %arg5: memref<1x176xf32, #tpu.memory_space<vmem>>, %arg6: memref<32x1xf32, #tpu.memory_space<vmem>>, %arg7: memref<32x1xf32, #tpu.memory_space<vmem>>, %arg8: memref<32x1xf32, #tpu.memory_space<vmem>>, %arg9: memref<32x1xf32, #tpu.memory_space<vmem>>, %arg10: memref<32x1xf32, #tpu.memory_space<vmem>>, %arg11: memref<32x1xf32, #tpu.memory_space<vmem>>, %arg12: memref<1x32x128xf32, #tpu.memory_space<vmem>>) attributes {dimension_semantics = [#tpu.dimension_semantics<parallel>], iteration_bounds = array<i64: 2>, scalar_prefetch = 0 : i64, scratch_operands = 0 : i64, tpu.core_type = #tpu.core_type<tc>, window_params = [{transform_indices = @transform_0, window_bounds = array<i64: 1, 64, 176>}, {pipeline_mode = #tpu.pipeline_mode<synchronous>, transform_indices = @transform_1, window_bounds = array<i64: 32, 64>}, {pipeline_mode = #tpu.pipeline_mode<synchronous>, transform_indices = @transform_2, window_bounds = array<i64: 9, 32, 1>}, {pipeline_mode = #tpu.pipeline_mode<synchronous>, transform_indices = @transform_3, window_bounds = array<i64: 32, 32>}, {pipeline_mode = #tpu.pipeline_mode<synchronous>, transform_indices = @transform_4, window_bounds = array<i64: 1, 176>}, {pipeline_mode = #tpu.pipeline_mode<synchronous>, transform_indices = @transform_5, window_bounds = array<i64: 32, 1>}, {pipeline_mode = #tpu.pipeline_mode<synchronous>, transform_indices = @transform_6, window_bounds = array<i64: 32, 1>}, {pipeline_mode = #tpu.pipeline_mode<synchronous>, transform_indices = @transform_7, window_bounds = array<i64: 32, 1>}, {pipeline_mode = #tpu.pipeline_mode<synchronous>, transform_indices = @transform_8, window_bounds = array<i64: 32, 1>}, {pipeline_mode = #tpu.pipeline_mode<synchronous>, transform_indices = @transform_9, window_bounds = array<i64: 32, 1>}, {pipeline_mode = #tpu.pipeline_mode<synchronous>, transform_indices = @transform_10, window_bounds = array<i64: 32, 1>}, {transform_indices = @transform_11, window_bounds = array<i64: 1, 32, 128>}]} {
    %c0 = arith.constant 0 : index
    %c0_0 = arith.constant 0 : index
    %0 = vector.load %arg2[%c0, %c0_0] : memref<32x64xf32, #tpu.memory_space<vmem>>, vector<32x64xf32>
    %c0_1 = arith.constant 0 : index
    %c0_2 = arith.constant 0 : index
    %c0_3 = arith.constant 0 : index
    %1 = vector.load %arg1[%c0_1, %c0_2, %c0_3] : memref<1x64x176xf32, #tpu.memory_space<vmem>>, vector<1x64x176xf32>
    %2 = vector.shape_cast %1 : vector<1x64x176xf32> to vector<64x176xf32>
    %cst = arith.constant dense<0.000000e+00> : vector<32x176xf32>
    %3 = tpu.matmul %0, %2, %cst {dimension_numbers = #tpu.dot_dimension_numbers<[1], [0], [0], [1], [0, 0, 1, 1], [], []>} : vector<32x64xf32>, vector<64x176xf32>, vector<32x176xf32> -> vector<32x176xf32>
    %c0_4 = arith.constant 0 : index
    %c0_5 = arith.constant 0 : index
    %4 = vector.load %arg6[%c0_4, %c0_5] : memref<32x1xf32, #tpu.memory_space<vmem>>, vector<32x1xf32>
    %5 = vector.broadcast %4 : vector<32x1xf32> to vector<32x176xf32>
    %6 = arith.mulf %3, %5 : vector<32x176xf32>
    %c0_6 = arith.constant 0 : index
    %c0_7 = arith.constant 0 : index
    %7 = vector.load %arg7[%c0_6, %c0_7] : memref<32x1xf32, #tpu.memory_space<vmem>>, vector<32x1xf32>
    %8 = vector.broadcast %7 : vector<32x1xf32> to vector<32x176xf32>
    %9 = arith.addf %6, %8 : vector<32x176xf32>
    %cst_8 = arith.constant 0.000000e+00 : f32
    %10 = vector.broadcast %cst_8 : f32 to vector<32x176xf32>
    %11 = arith.maximumf %9, %10 : vector<32x176xf32>
    %c0_9 = arith.constant 0 : index
    %c0_10 = arith.constant 0 : index
    %12 = vector.load %arg5[%c0_9, %c0_10] : memref<1x176xf32, #tpu.memory_space<vmem>>, vector<1x176xf32>
    %13 = vector.broadcast %12 : vector<1x176xf32> to vector<32x176xf32>
    %14 = arith.mulf %11, %13 : vector<32x176xf32>
    %c0_11 = arith.constant 0 : index
    %c0_12 = arith.constant 0 : index
    %c0_13 = arith.constant 0 : index
    %15 = vector.load %arg3[%c0_11, %c0_12, %c0_13] : memref<9x32x1xf32, #tpu.memory_space<vmem>>, vector<9x32x1xf32>
    %16 = vector.extract_strided_slice %14 {offsets = [0, 0], sizes = [32, 128], strides = [1, 1]} : vector<32x176xf32> to vector<32x128xf32>
    %17 = vector.extract_strided_slice %15 {offsets = [0, 0, 0], sizes = [1, 32, 1], strides = [1, 1, 1]} : vector<9x32x1xf32> to vector<1x32x1xf32>
    %18 = vector.shape_cast %17 : vector<1x32x1xf32> to vector<32x1xf32>
    %19 = vector.broadcast %18 : vector<32x1xf32> to vector<32x128xf32>
    %20 = arith.mulf %16, %19 : vector<32x128xf32>
    %21 = vector.extract_strided_slice %14 {offsets = [0, 1], sizes = [32, 128], strides = [1, 1]} : vector<32x176xf32> to vector<32x128xf32>
    %22 = vector.extract_strided_slice %15 {offsets = [1, 0, 0], sizes = [1, 32, 1], strides = [1, 1, 1]} : vector<9x32x1xf32> to vector<1x32x1xf32>
    %23 = vector.shape_cast %22 : vector<1x32x1xf32> to vector<32x1xf32>
    %24 = vector.broadcast %23 : vector<32x1xf32> to vector<32x128xf32>
    %25 = arith.mulf %21, %24 : vector<32x128xf32>
    %26 = arith.addf %20, %25 : vector<32x128xf32>
    %27 = vector.extract_strided_slice %14 {offsets = [0, 2], sizes = [32, 128], strides = [1, 1]} : vector<32x176xf32> to vector<32x128xf32>
    %28 = vector.extract_strided_slice %15 {offsets = [2, 0, 0], sizes = [1, 32, 1], strides = [1, 1, 1]} : vector<9x32x1xf32> to vector<1x32x1xf32>
    %29 = vector.shape_cast %28 : vector<1x32x1xf32> to vector<32x1xf32>
    %30 = vector.broadcast %29 : vector<32x1xf32> to vector<32x128xf32>
    %31 = arith.mulf %27, %30 : vector<32x128xf32>
    %32 = arith.addf %26, %31 : vector<32x128xf32>
    %33 = vector.extract_strided_slice %14 {offsets = [0, 16], sizes = [32, 128], strides = [1, 1]} : vector<32x176xf32> to vector<32x128xf32>
    %34 = vector.extract_strided_slice %15 {offsets = [3, 0, 0], sizes = [1, 32, 1], strides = [1, 1, 1]} : vector<9x32x1xf32> to vector<1x32x1xf32>
    %35 = vector.shape_cast %34 : vector<1x32x1xf32> to vector<32x1xf32>
    %36 = vector.broadcast %35 : vector<32x1xf32> to vector<32x128xf32>
    %37 = arith.mulf %33, %36 : vector<32x128xf32>
    %38 = arith.addf %32, %37 : vector<32x128xf32>
    %39 = vector.extract_strided_slice %14 {offsets = [0, 17], sizes = [32, 128], strides = [1, 1]} : vector<32x176xf32> to vector<32x128xf32>
    %40 = vector.extract_strided_slice %15 {offsets = [4, 0, 0], sizes = [1, 32, 1], strides = [1, 1, 1]} : vector<9x32x1xf32> to vector<1x32x1xf32>
    %41 = vector.shape_cast %40 : vector<1x32x1xf32> to vector<32x1xf32>
    %42 = vector.broadcast %41 : vector<32x1xf32> to vector<32x128xf32>
    %43 = arith.mulf %39, %42 : vector<32x128xf32>
    %44 = arith.addf %38, %43 : vector<32x128xf32>
    %45 = vector.extract_strided_slice %14 {offsets = [0, 18], sizes = [32, 128], strides = [1, 1]} : vector<32x176xf32> to vector<32x128xf32>
    %46 = vector.extract_strided_slice %15 {offsets = [5, 0, 0], sizes = [1, 32, 1], strides = [1, 1, 1]} : vector<9x32x1xf32> to vector<1x32x1xf32>
    %47 = vector.shape_cast %46 : vector<1x32x1xf32> to vector<32x1xf32>
    %48 = vector.broadcast %47 : vector<32x1xf32> to vector<32x128xf32>
    %49 = arith.mulf %45, %48 : vector<32x128xf32>
    %50 = arith.addf %44, %49 : vector<32x128xf32>
    %51 = vector.extract_strided_slice %14 {offsets = [0, 32], sizes = [32, 128], strides = [1, 1]} : vector<32x176xf32> to vector<32x128xf32>
    %52 = vector.extract_strided_slice %15 {offsets = [6, 0, 0], sizes = [1, 32, 1], strides = [1, 1, 1]} : vector<9x32x1xf32> to vector<1x32x1xf32>
    %53 = vector.shape_cast %52 : vector<1x32x1xf32> to vector<32x1xf32>
    %54 = vector.broadcast %53 : vector<32x1xf32> to vector<32x128xf32>
    %55 = arith.mulf %51, %54 : vector<32x128xf32>
    %56 = arith.addf %50, %55 : vector<32x128xf32>
    %57 = vector.extract_strided_slice %14 {offsets = [0, 33], sizes = [32, 128], strides = [1, 1]} : vector<32x176xf32> to vector<32x128xf32>
    %58 = vector.extract_strided_slice %15 {offsets = [7, 0, 0], sizes = [1, 32, 1], strides = [1, 1, 1]} : vector<9x32x1xf32> to vector<1x32x1xf32>
    %59 = vector.shape_cast %58 : vector<1x32x1xf32> to vector<32x1xf32>
    %60 = vector.broadcast %59 : vector<32x1xf32> to vector<32x128xf32>
    %61 = arith.mulf %57, %60 : vector<32x128xf32>
    %62 = arith.addf %56, %61 : vector<32x128xf32>
    %63 = vector.extract_strided_slice %14 {offsets = [0, 34], sizes = [32, 128], strides = [1, 1]} : vector<32x176xf32> to vector<32x128xf32>
    %64 = vector.extract_strided_slice %15 {offsets = [8, 0, 0], sizes = [1, 32, 1], strides = [1, 1, 1]} : vector<9x32x1xf32> to vector<1x32x1xf32>
    %65 = vector.shape_cast %64 : vector<1x32x1xf32> to vector<32x1xf32>
    %66 = vector.broadcast %65 : vector<32x1xf32> to vector<32x128xf32>
    %67 = arith.mulf %63, %66 : vector<32x128xf32>
    %68 = arith.addf %62, %67 : vector<32x128xf32>
    %c0_14 = arith.constant 0 : index
    %c0_15 = arith.constant 0 : index
    %69 = vector.load %arg8[%c0_14, %c0_15] : memref<32x1xf32, #tpu.memory_space<vmem>>, vector<32x1xf32>
    %70 = vector.broadcast %69 : vector<32x1xf32> to vector<32x128xf32>
    %71 = arith.mulf %68, %70 : vector<32x128xf32>
    %c0_16 = arith.constant 0 : index
    %c0_17 = arith.constant 0 : index
    %72 = vector.load %arg9[%c0_16, %c0_17] : memref<32x1xf32, #tpu.memory_space<vmem>>, vector<32x1xf32>
    %73 = vector.broadcast %72 : vector<32x1xf32> to vector<32x128xf32>
    %74 = arith.addf %71, %73 : vector<32x128xf32>
    %cst_18 = arith.constant 0.000000e+00 : f32
    %75 = vector.broadcast %cst_18 : f32 to vector<32x128xf32>
    %76 = arith.maximumf %74, %75 : vector<32x128xf32>
    %c0_19 = arith.constant 0 : index
    %c0_20 = arith.constant 0 : index
    %77 = vector.load %arg4[%c0_19, %c0_20] : memref<32x32xf32, #tpu.memory_space<vmem>>, vector<32x32xf32>
    %cst_21 = arith.constant dense<0.000000e+00> : vector<32x128xf32>
    %78 = tpu.matmul %77, %76, %cst_21 {dimension_numbers = #tpu.dot_dimension_numbers<[1], [0], [0], [1], [0, 0, 1, 1], [], []>} : vector<32x32xf32>, vector<32x128xf32>, vector<32x128xf32> -> vector<32x128xf32>
    %c0_22 = arith.constant 0 : index
    %c0_23 = arith.constant 0 : index
    %79 = vector.load %arg10[%c0_22, %c0_23] : memref<32x1xf32, #tpu.memory_space<vmem>>, vector<32x1xf32>
    %80 = vector.broadcast %79 : vector<32x1xf32> to vector<32x128xf32>
    %81 = arith.mulf %78, %80 : vector<32x128xf32>
    %c0_24 = arith.constant 0 : index
    %c0_25 = arith.constant 0 : index
    %82 = vector.load %arg11[%c0_24, %c0_25] : memref<32x1xf32, #tpu.memory_space<vmem>>, vector<32x1xf32>
    %83 = vector.broadcast %82 : vector<32x1xf32> to vector<32x128xf32>
    %84 = arith.addf %81, %83 : vector<32x128xf32>
    %cst_26 = arith.constant 0.000000e+00 : f32
    %85 = vector.broadcast %cst_26 : f32 to vector<32x128xf32>
    %86 = arith.maximumf %84, %85 : vector<32x128xf32>
    %c0_27 = arith.constant 0 : index
    %c0_28 = arith.constant 0 : index
    %c0_29 = arith.constant 0 : index
    %87 = vector.load %arg12[%c0_27, %c0_28, %c0_29] : memref<1x32x128xf32, #tpu.memory_space<vmem>>, vector<1x32x128xf32>
    %88 = vector.shape_cast %87 : vector<1x32x128xf32> to vector<32x128xf32>
    %89 = vector.shape_cast %86 : vector<32x128xf32> to vector<1x32x128xf32>
    tpu.vector_store %arg12[%c0_27, %c0_28, %c0_29], %89 {strides = array<i32>} : memref<1x32x128xf32, #tpu.memory_space<vmem>>, vector<1x32x128xf32>,
    return
  }
  func.func @transform_0(%arg0: i32) -> (i32, i32, i32) {
    %c0_i32 = arith.constant 0 : i32
    %c0_i32_0 = arith.constant 0 : i32
    %c0_i32_1 = arith.constant 0 : i32
    return %arg0, %c0_i32, %c0_i32_0 : i32, i32, i32
  }
  func.func @transform_1(%arg0: i32) -> (i32, i32) {
    %c0_i32 = arith.constant 0 : i32
    %c0_i32_0 = arith.constant 0 : i32
    %c0_i32_1 = arith.constant 0 : i32
    return %c0_i32, %c0_i32_0 : i32, i32
  }
  func.func @transform_2(%arg0: i32) -> (i32, i32, i32) {
    %c0_i32 = arith.constant 0 : i32
    %c0_i32_0 = arith.constant 0 : i32
    %c0_i32_1 = arith.constant 0 : i32
    %c0_i32_2 = arith.constant 0 : i32
    return %c0_i32, %c0_i32_0, %c0_i32_1 : i32, i32, i32
  }
  func.func @transform_3(%arg0: i32) -> (i32, i32) {
    %c0_i32 = arith.constant 0 : i32
    %c0_i32_0 = arith.constant 0 : i32
    %c0_i32_1 = arith.constant 0 : i32
    return %c0_i32, %c0_i32_0 : i32, i32
  }
  func.func @transform_4(%arg0: i32) -> (i32, i32) {
    %c0_i32 = arith.constant 0 : i32
    %c0_i32_0 = arith.constant 0 : i32
    %c0_i32_1 = arith.constant 0 : i32
    return %c0_i32, %c0_i32_0 : i32, i32
  }
  func.func @transform_5(%arg0: i32) -> (i32, i32) {
    %c0_i32 = arith.constant 0 : i32
    %c0_i32_0 = arith.constant 0 : i32
    %c0_i32_1 = arith.constant 0 : i32
    return %c0_i32, %c0_i32_0 : i32, i32
  }
  func.func @transform_6(%arg0: i32) -> (i32, i32) {
    %c0_i32 = arith.constant 0 : i32
    %c0_i32_0 = arith.constant 0 : i32
    %c0_i32_1 = arith.constant 0 : i32
    return %c0_i32, %c0_i32_0 : i32, i32
  }
  func.func @transform_7(%arg0: i32) -> (i32, i32) {
    %c0_i32 = arith.constant 0 : i32
    %c0_i32_0 = arith.constant 0 : i32
    %c0_i32_1 = arith.constant 0 : i32
    return %c0_i32, %c0_i32_0 : i32, i32
  }
  func.func @transform_8(%arg0: i32) -> (i32, i32) {
    %c0_i32 = arith.constant 0 : i32
    %c0_i32_0 = arith.constant 0 : i32
    %c0_i32_1 = arith.constant 0 : i32
    return %c0_i32, %c0_i32_0 : i32, i32
  }
  func.func @transform_9(%arg0: i32) -> (i32, i32) {
    %c0_i32 = arith.constant 0 : i32
    %c0_i32_0 = arith.constant 0 : i32
    %c0_i32_1 = arith.constant 0 : i32
    return %c0_i32, %c0_i32_0 : i32, i32
  }
  func.func @transform_10(%arg0: i32) -> (i32, i32) {
    %c0_i32 = arith.constant 0 : i32
    %c0_i32_0 = arith.constant 0 : i32
    %c0_i32_1 = arith.constant 0 : i32
    return %c0_i32, %c0_i32_0 : i32, i32
  }
  func.func @transform_11(%arg0: i32) -> (i32, i32, i32) {
    %c0_i32 = arith.constant 0 : i32
    %c0_i32_0 = arith.constant 0 : i32
    %c0_i32_1 = arith.constant 0 : i32
    return %arg0, %c0_i32, %c0_i32_0 : i32, i32, i32
  }
}

</mosaic_0001>

<bundles_post_ra>
// kernel: squeeze.2
= control target key start
LH: loop header
LB: loop body
LE: loop exit
PB: predicated region body
PF: predicated region fallthrough
CT: control target
= control target key end

     0   :  { %vm15_vm0 = vcmask 261120   ;;  %s59_s0 = inlined_call_operand.vmem [shape: f32[32,3,3], index: 0, kind: input, shape index: {}]   ;;  %s60_s1 = inlined_call_operand.vmem [shape: f32[32,9], index: 1, kind: output, shape index: {}]  }
   0x1   :  { %v27_v0 = vld [vmem:[%s59_s0 + $0x8] sm:$0xf]  ;;  %v28_v1 = vld [vmem:[%s59_s0 + $0x4] sm:$0xf]  ;;  %v12_v2 = vld [vmem:[%s59_s0] sm:$0xf] }
   0x2   :  { %7 = vst [vmem:[#allocation0] sm:$0xf] %v27_v0 }
   0x3   :  { %11 = vst [vmem:[#allocation0 + $0x10] sm:$0xf] %v28_v1 }
   0x4   :  { %13 = vst [vmem:[#allocation0 + $0x8] sm:$0xf] %v12_v2 }
   0x9   :  { %v23_v3 = vld [vmem:[#allocation0] sm:$0x7]  }
   0xa   :  { %v18_v4 = vld [vmem:[#allocation0 + $0x10] sm:$0x7]   ;;  %30 = vst.msk [vmem:[%s60_s1 + $0x6] sm:$0x7] %vm15_vm0, %v23_v3  }
   0xb   :  { %v14_v5 = vld [vmem:[#allocation0 + $0x8] sm:$0x7]   ;;  %29 = vst.msk [vmem:[%s60_s1 + $0x3] sm:$0x7] %vm15_vm0, %v18_v4  }
   0xc   :  { %16 = vst.msk [vmem:[%s60_s1] sm:$0x7] %vm15_vm0, %v14_v5  }

// kernel: stemnet_forward.1
= control target key start
LH: loop header
LB: loop body
LE: loop exit
PB: predicated region body
PF: predicated region fallthrough
CT: control target
= control target key end

     0   :  { %s1507_s17 = smov 0   ;;  %s2015_s0 = inlined_call_operand.vmem [shape: f32[2,64,176], index: 0, kind: input, shape index: {}]   ;;  %s2016_s1 = inlined_call_operand.vmem [shape: f32[32,64], index: 1, kind: input, shape index: {}]   ;;  %s2017_s2 = inlined_call_operand.vmem [shape: f32[9,32,1], index: 2, kind: input, shape index: {}]   ;;  %s2018_s3 = inlined_call_operand.vmem [shape: f32[32,32], index: 3, kind: input, shape index: {}]   ;;  %s2019_s4 = inlined_call_operand.vmem [shape: f32[1,176], index: 4, kind: input, shape index: {}]   ;;  %s2020_s5 = inlined_call_operand.vmem [shape: f32[32,1], index: 5, kind: input, shape index: {}]   ;;  %s2021_s6 = inlined_call_operand.vmem [shape: f32[32,1], index: 6, kind: input, shape index: {}]   ;;  %s2022_s7 = inlined_call_operand.vmem [shape: f32[32,1], index: 7, kind: input, shape index: {}]   ;;  %s2023_s8 = inlined_call_operand.vmem [shape: f32[32,1], index: 8, kind: input, shape index: {}]   ;;  %s2024_s9 = inlined_call_operand.vmem [shape: f32[32,1], index: 9, kind: input, shape index: {}]   ;;  %s2025_s10 = inlined_call_operand.vmem [shape: f32[32,1], index: 10, kind: input, shape index: {}]   ;;  %s2026_s11 = inlined_call_operand.vmem [shape: f32[2,32,128], index: 11, kind: output, shape index: {}]  }
   0x1 LB: > { %s1369_s18 = sadd.s32 4294967295, %s1436_s17   ;;  %p1373_p0 = scmp.ge.s32.totalorder %s1436_s17, 1  ;;  %s1436_s17 = sphi %s1507_s17, %s21_s17  }
   0x2   : > { %p337_p1 = scmp.lt.s32.totalorder %s1436_s17, 3 }
   0x4   : > { %p338_p2 = pnand %p1373_p0, %p337_p1 }
   0x5   : > { %p377_p3 = scmp.lt.s32.totalorder (!%p338_p2), %s1369_s18, 1  ;;  %s1439_s27 = smov (!%p338_p2), 127  }
   0x6   : > { %341 = sbr.rel (%p338_p2) target bundleno = 738 (0x2e2), region = 64  ;;  %s1440_s29 = smov (!%p338_p2), 126  }
   0x7   : > { %s1441_s30 = smov (!%p338_p2), 112   ;;  %s1443_s14 = smov (!%p338_p2), 110  }
   0x8   : > { %s1445_s26 = smov (!%p338_p2), 95   ;;  %s1446_s12 = smov (!%p338_p2), 94  }
   0xb   : > { %v510_v0 = vld [vmem:[%s2021_s6] sm:$0xff]  ;;  %v480_v1 = vld [vmem:[%s2020_s5 + $0x10] sm:$0xff]  ;;  %v1438_v3 = vmov 0   ;;  %s2028_s18 = smov (!%p377_p3, %s1369_s18), 1  ;;  %v511_v8 = vld [vmem:[%s2021_s6 + $0x8] sm:$0xff]  ;;  %vm407_vm0 = vcmask 523264  }
   0xc   : > { %v478_v2 = vld [vmem:[%s2020_s5] sm:$0xff]  ;;  %1429 = vset.pattern.permute.xlu2 %v1438_v3  ;;  %1428 = vset.pattern.permute.xlu1 %v1438_v3  ;;  %s1392_s25 = sshll.u32 %s2028_s18, 7  ;;  %v481_v9 = vld [vmem:[%s2020_s5 + $0x18] sm:$0xff]  ;;  %v479_v10 = vld [vmem:[%s2020_s5 + $0x8] sm:$0xff]  ;;  %vm676_vm1 = vcmask 1039360   ;;  %vm741_vm2 = vcmask 1031168  }
   0xd   : > { %1427 = vset.pattern.permute.xlu0 %v1438_v3  ;;  %516 = vperm.xlu2 %1429, %v510_v0   ;;  %s1530_s28 = scalar_lea.vmem %s2015_s0, %s1392_s25  ;;  %v564_v19 = vld [vmem:[%s2017_s2] sm:$0xff]  ;;  %v513_v20 = vld [vmem:[%s2021_s6 + $0x18] sm:$0xff]  ;;  %v512_v21 = vld [vmem:[%s2021_s6 + $0x10] sm:$0xff]  ;;  %s1444_s25 = smov 96   ;;  %vm806_vm3 = vcmask 916480   ;;  %vm871_vm4 = vcmask 908288  }
   0xe   : > { %494 = vperm.xlu1 %1428, %v480_v1   ;;  %484 = vperm.xlu0 %1427, %v478_v2   ;;  %v405_v4 = vld [vmem:[%s1530_s28 + $0x70] sm:$0xff]  ;;  %v406_v5 = vld [vmem:[%s1530_s28 + $0x78] sm:$0xff]  ;;  %v403_v6 = vld [vmem:[%s1530_s28 + $0x60] sm:$0xff]  ;;  %vm936_vm5 = vcmask 900096   ;;  %vm1001_vm6 = vcmask 785408   ;;  %vm1066_vm7 = vcmask 777216  }
   0xf   : > { %428 = vmatpush.msra.mxu0 %v405_v4  ;;  %1394 = vmatpush.msra.mxu3 %v405_v4  ;;  %v404_v7 = vld [vmem:[%s1530_s28 + $0x68] sm:$0xff]  ;;  %v401_v11 = vld [vmem:[%s1530_s28 + $0x50] sm:$0xff]  ;;  %v402_v12 = vld [vmem:[%s1530_s28 + $0x58] sm:$0xff]  ;;  %vm1131_vm8 = vcmask 769024   ;;  %vm1208_vm9 = vcmask 261120   ;;  %s1393_s16 = sshll.u32 %s2028_s18, 5 }
  0x10   : > { %1402 = vmatpush.msra.mxu1 %v406_v5  ;;  %v399_v13 = vld [vmem:[%s1530_s28 + $0x40] sm:$0xff]  ;;  %v400_v14 = vld [vmem:[%s1530_s28 + $0x48] sm:$0xff]  ;;  %v397_v15 = vld [vmem:[%s1530_s28 + $0x30] sm:$0xff]  ;;  %s386_s20 = scalar_lea.vmem %s2026_s11, %s1393_s16 }
  0x11   : > { %429 = vmatpush.msra.mxu0 %v403_v6  ;;  %1395 = vmatpush.msra.mxu3 %v403_v6  ;;  %v398_v16 = vld [vmem:[%s1530_s28 + $0x38] sm:$0xff]  ;;  %v395_v17 = vld [vmem:[%s1530_s28 + $0x20] sm:$0xff]  ;;  %v396_v18 = vld [vmem:[%s1530_s28 + $0x28] sm:$0xff] }
  0x12   : > { %1403 = vmatpush.msra.mxu1 %v404_v7  ;;  %v393_v22 = vld [vmem:[%s1530_s28 + $0x10] sm:$0xff]  ;;  %v394_v23 = vld [vmem:[%s1530_s28 + $0x18] sm:$0xff]  ;;  %v391_v24 = vld [vmem:[%s1530_s28] sm:$0xff] }
  0x13   : > { %430 = vmatpush.msra.mxu0 %v401_v11  ;;  %1396 = vmatpush.msra.mxu3 %v401_v11  ;;  %v392_v25 = vld [vmem:[%s1530_s28 + $0x8] sm:$0xff]  ;;  %v387_v26 = vld [vmem:[%s2016_s1] sm:$0xff]  ;;  %v567_v28 = vld [vmem:[%s2017_s2 + $0x18] sm:$0xff]  ;;  %s1442_s28 = smov 111  }
  0x14   : > { %1404 = vmatpush.msra.mxu1 %v402_v12  ;;  %v388_v27 = vld [vmem:[%s2016_s1 + $0x8] sm:$0xff]  ;;  %v566_v29 = vld [vmem:[%s2017_s2 + $0x10] sm:$0xff]  ;;  %v568_v34 = vld [vmem:[%s2017_s2 + $0x20] sm:$0xff] }
  0x15   : > { %521 = vperm.xlu2 %1429, %v511_v8   ;;  %431 = vmatpush.msra.mxu0 %v399_v13  ;;  %v565_v30 = vld [vmem:[%s2017_s2 + $0x8] sm:$0xff]  ;;  %v389_v31 = vld [vmem:[%s2016_s1 + $0x10] sm:$0xff]  ;;  %v390_v35 = vld [vmem:[%s2016_s1 + $0x18] sm:$0xff] }
  0x16   : > { %499 = vperm.xlu1 %1428, %v481_v9   ;;  %489 = vperm.xlu0 %1427, %v479_v10   ;;  %v570_v32 = vld [vmem:[%s2017_s2 + $0x30] sm:$0xff]  ;;  %v569_v33 = vld [vmem:[%s2017_s2 + $0x28] sm:$0xff]  ;;  %v571_v38 = vld [vmem:[%s2017_s2 + $0x38] sm:$0xff] }
  0x17   : > { %1397 = vmatpush.msra.mxu3 %v399_v13  ;;  %1405 = vmatpush.msra.mxu1 %v400_v14  ;;  %v574_v36 = vld [vmem:[%s2017_s2 + $0x50] sm:$0xff]  ;;  %v573_v37 = vld [vmem:[%s2017_s2 + $0x48] sm:$0xff]  ;;  %v572_v41 = vld [vmem:[%s2017_s2 + $0x40] sm:$0xff] }
  0x18   : > { %432 = vmatpush.msra.mxu0 %v397_v15  ;;  %v578_v39 = vld [vmem:[%s2017_s2 + $0x70] sm:$0xff]  ;;  %v577_v40 = vld [vmem:[%s2017_s2 + $0x68] sm:$0xff]  ;;  %v575_v44 = vld [vmem:[%s2017_s2 + $0x58] sm:$0xff] }
  0x19   : > { %1398 = vmatpush.msra.mxu3 %v397_v15  ;;  %1406 = vmatpush.msra.mxu1 %v398_v16  ;;  %v582_v42 = vld [vmem:[%s2017_s2 + $0x90] sm:$0xff]  ;;  %v581_v43 = vld [vmem:[%s2017_s2 + $0x88] sm:$0xff]  ;;  %v576_v47 = vld [vmem:[%s2017_s2 + $0x60] sm:$0xff] }
  0x1a   : > { %433 = vmatpush.msra.mxu0 %v395_v17  ;;  %v586_v45 = vld [vmem:[%s2017_s2 + $0xb0] sm:$0xff]  ;;  %v585_v46 = vld [vmem:[%s2017_s2 + $0xa8] sm:$0xff]  ;;  %v579_v48 = vld [vmem:[%s2017_s2 + $0x78] sm:$0xff] }
  0x1b   : > { %1399 = vmatpush.msra.mxu3 %v395_v17  ;;  %1407 = vmatpush.msra.mxu1 %v396_v18  ;;  %v580_v49 = vld [vmem:[%s2017_s2 + $0x80] sm:$0xff]  ;;  %v583_v50 = vld [vmem:[%s2017_s2 + $0x98] sm:$0xff] }
  0x1c   : > { %434 = vmatpush.msra.mxu0 %v393_v22  ;;  %v584_v51 = vld [vmem:[%s2017_s2 + $0xa0] sm:$0xff] }
  0x1d   : > { %602 = vperm.xlu2 %1429, %v564_v19   ;;  %1400 = vmatpush.msra.mxu3 %v393_v22  ;;  %v550_v62 = vld [vmem:[%s2019_s4] sm:$0x3] }
  0x1e   : > { %531 = vperm.xlu1 %1428, %v513_v20   ;;  %526 = vperm.xlu0 %1427, %v512_v21   ;;  %v1663_v3 = vperm.slane %v550_v62, 0  ;;  %v1668_v13 = vperm.slane %v550_v62, 1 }
  0x1f   : > { %1408 = vmatpush.msra.mxu1 %v394_v23  ;;  %435 = vmatpush.msra.mxu0 %v391_v24 }
  0x20   : > { %1401 = vmatpush.msra.mxu3 %v391_v24  ;;  %1378 = vmatmul.msk.f32.vlgmr.msra.gmra.mxu0 %vm407_vm0, %v387_v26 }
  0x21   : > { %1409 = vmatpush.msra.mxu1 %v392_v25  ;;  %1379 = vmatmul.msk.f32.vlgmr.msra.gmra.mxu3 %vm407_vm0, %v388_v27 }
  0x22   : > { %457 = vmatpush.msrb.mxu0 %v406_v5  ;;  %1383 = vmatmul.msk.f32.vlgmr.msra.gmra.mxu1 %vm407_vm0, %v388_v27 }
  0x24   : > { %458 = vmatpush.msrb.mxu0 %v404_v7 }
  0x25   : > { %617 = vperm.xlu2 %1429, %v567_v28  }
  0x26   : > { %612 = vperm.xlu1 %1428, %v566_v29   ;;  %607 = vperm.xlu0 %1427, %v565_v30  }
  0x27   : > { %459 = vmatpush.msrb.mxu0 %v402_v12 }
  0x29   : > { %460 = vmatpush.msrb.mxu0 %v400_v14  ;;  %1380 = vmatmul.msk.f32.gmra.mxu3 %vm407_vm0, %v389_v31 }
  0x2a   : > { %1384 = vmatmul.msk.f32.gmra.mxu1 %vm407_vm0, %v389_v31 }
  0x2b   : > { %461 = vmatpush.msrb.mxu0 %v398_v16 }
  0x2d   : > { %462 = vmatpush.msrb.mxu0 %v396_v18  ;;  %636 = vperm.xlu2 %1429, %v570_v32  }
  0x2e   : > { %631 = vperm.xlu1 %1428, %v569_v33   ;;  %626 = vperm.xlu0 %1427, %v568_v34  }
  0x2f   : > { %463 = vmatpush.msrb.mxu0 %v394_v23 }
  0x31   : > { %464 = vmatpush.msrb.mxu0 %v392_v25  ;;  %1381 = vmatmul.msk.f32.gmra.mxu3 %vm407_vm0, %v390_v35 }
  0x32   : > { %1382 = vmatmul.msk.f32.vlgmr.msrb.gmra.mxu0 %vm407_vm0, %v387_v26  ;;  %1385 = vmatmul.msk.f32.gmra.mxu1 %vm407_vm0, %v390_v35 }
  0x35   : > { %701 = vperm.xlu2 %1429, %v574_v36  }
  0x36   : > { %696 = vperm.xlu1 %1428, %v573_v37   ;;  %641 = vperm.xlu0 %1427, %v571_v38  }
  0x3d   : > { %766 = vperm.xlu2 %1429, %v578_v39  }
  0x3e   : > { %761 = vperm.xlu1 %1428, %v577_v40   ;;  %691 = vperm.xlu0 %1427, %v572_v41  }
  0x45   : > { %831 = vperm.xlu2 %1429, %v582_v42  }
  0x46   : > { %826 = vperm.xlu1 %1428, %v581_v43   ;;  %706 = vperm.xlu0 %1427, %v575_v44  }
  0x4d   : > { %896 = vperm.xlu2 %1429, %v586_v45  }
  0x4e   : > { %891 = vperm.xlu1 %1428, %v585_v46   ;;  %756 = vperm.xlu0 %1427, %v576_v47  }
  0x56   : > { %771 = vperm.xlu0 %1427, %v579_v48  }
  0x5e   : > { %821 = vperm.xlu0 %1427, %v580_v49  }
  0x66   : > { %836 = vperm.xlu0 %1427, %v583_v50  }
  0x67   : > { %v517_v59 = vpop.permute.xlu2 %516 }
  0x6e   : > { %886 = vperm.xlu0 %1427, %v584_v51  }
  0x6f   : > { %v522_v5 = vpop.permute.xlu2 %521 }
  0x77   : > { %v1688_v33 = vpop.permute.xlu2 %602 }
  0x7f   : > { %v1707_v49 = vpop.permute.xlu2 %617 }
  0x80   : > { %v1652_v52 = vpop.permute.xlu1 %494  ;;  %v485_v53 = vpop.permute.xlu0 %484 }
  0x87   : > { %v637_v62 = vpop.permute.xlu2 %636 }
  0x88   : > { %v500_v54 = vpop.permute.xlu1 %499  ;;  %v490_v55 = vpop.permute.xlu0 %489 }
  0x90   : > { %v1654_v56 = vpop.permute.xlu0 %526  ;;  %v532_v57 = vpop.permute.xlu1 %531 }
  0x98   : > { %v1656_v58 = vpop.permute.xlu0 %607  ;;  %v1658_v60 = vpop.permute.xlu1 %612 }
  0x9d   : > { %v437_v61 = vpop.f32.mrf.mxu0 }
  0x9e   : > { %v502_v63 = vmul.f32 %v485_v53, %v437_v61 }
  0x9f   : > { %v469_v1 = vpop.f32.mrf.mxu1 }
  0xa0   : > { %v627_v0 = vpop.permute.xlu0 %626  ;;  %v534_v2 = vadd.f32 %v517_v59, %v502_v63  ;;  %v505_v4 = vmul.f32 %v490_v55, %v469_v1  ;;  %v632_v9 = vpop.permute.xlu1 %631 }
  0xa2   : > { %v542_v6 = vmax.f32 %v534_v2, 0.0  ;;  %v537_v7 = vadd.f32 %v522_v5, %v505_v4 }
  0xa4   : > { %v1666_v8 = vmul.f32 %v1663_v3, %v542_v6  ;;  %v440_v10 = vpop.f32.mrf.mxu3  ;;  %v545_v12 = vmax.f32 %v537_v7, 0.0  ;;  %v702_v7 = vpop.permute.xlu2 %701 }
  0xa5   : > { %v504_v11 = vmul.f32 %v490_v55, %v440_v10 }
  0xa6   : > { %v644_v14 = vmul.f32 %v627_v0, %v1666_v8  ;;  %v1675_v19 = vmul.f32 %v1668_v13, %v545_v12 }
  0xa7   : > { %v536_v16 = vadd.f32 %v522_v5, %v504_v11  ;;  %v472_v17 = vpop.f32.mrf.mxu1  ;;  %v591_v11 = vld [vmem:[%s2017_s2 + $0xd8] sm:$0xff] }
  0xa8   : > { %v1671_v15 = vpop.permute.xlu0 %641  ;;  %660 = vrot.lane.b32.xlu1 %v644_v14, %s1439_s27  ;;  %v647_v25 = vmul.f32 %v632_v9, %v1675_v19  ;;  %v697_v26 = vpop.permute.xlu1 %696  ;;  %v507_v50 = vmul.f32 %v1652_v52, %v472_v17 }
  0xa9   : > { %v544_v18 = vmax.f32 %v536_v16, 0.0 }
  0xab   : > { %v1678_v20 = vmul.f32 %v1663_v3, %v544_v18 }
  0xac   : > { %v443_v21 = vpop.f32.mrf.mxu3  ;;  %v767_v14 = vpop.permute.xlu2 %766 }
  0xad   : > { %v506_v22 = vmul.f32 %v1652_v52, %v443_v21  ;;  %v646_v24 = vmul.f32 %v632_v9, %v1678_v20  ;;  %v711_v39 = vmul.f32 %v697_v26, %v1678_v20 }
  0xaf   : > { %v466_v23 = vpop.f32.mrf.mxu0  ;;  %v1684_v29 = vadd.f32 %v1654_v56, %v506_v22  ;;  %v475_v30 = vpop.f32.mrf.mxu1  ;;  %664 = vrot.lane.b32.xlu0 %v646_v24, %s1439_s27 }
  0xb0   : > { %v503_v27 = vmul.f32 %v485_v53, %v466_v23  ;;  %v692_v28 = vpop.permute.xlu0 %691  ;;  %v509_v32 = vmul.f32 %v500_v54, %v475_v30  ;;  %666 = vrot.lane.b32.xlu1 %v647_v25, %s1439_s27  ;;  %v762_v46 = vpop.permute.xlu1 %761  ;;  %v712_v53 = vmul.f32 %v697_v26, %v1675_v19  ;;  %v587_v26 = vld [vmem:[%s2017_s2 + $0xb8] sm:$0xff] }
  0xb1   : > { %v709_v42 = vmul.f32 %v692_v28, %v1666_v8  ;;  %v776_v51 = vmul.f32 %v762_v46, %v1678_v20  ;;  %v777_v4 = vmul.f32 %v762_v46, %v1675_v19  ;;  %v546_v12 = vmax.f32 %v1684_v29, 0.0  ;;  %v590_v29 = vld [vmem:[%s2017_s2 + $0xd0] sm:$0xff]  ;;  %v599_v46 = vld [vmem:[%s2017_s2 + $0x118] sm:$0xff] }
  0xb2   : > { %v535_v31 = vadd.f32 %v517_v59, %v503_v27  ;;  %v541_v35 = vadd.f32 %v532_v57, %v509_v32  ;;  %v595_v27 = vld [vmem:[%s2017_s2 + $0xf8] sm:$0xff]  ;;  %v594_v32 = vld [vmem:[%s2017_s2 + $0xf0] sm:$0xff] }
  0xb3   : > { %v1743_v16 = vmul.f32 %v1663_v3, %v546_v12 }
  0xb4   : > { %v543_v34 = vmax.f32 %v535_v31, 0.0  ;;  %v549_v37 = vmax.f32 %v541_v35, 0.0  ;;  %v446_v38 = vpop.f32.mrf.mxu3  ;;  %v832_v23 = vpop.permute.xlu2 %831 }
  0xb5   : > { %v508_v40 = vmul.f32 %v500_v54, %v446_v38  ;;  %v648_v21 = vmul.f32 %v637_v62, %v1743_v16  ;;  %v713_v25 = vmul.f32 %v702_v7, %v1743_v16  ;;  %v843_v31 = vmul.f32 %v832_v23, %v1743_v16 }
  0xb6   : > { %v1691_v36 = vmul.f32 %v1668_v13, %v543_v34  ;;  %v1695_v41 = vmul.f32 %v1668_v13, %v549_v37  ;;  %v593_v37 = vld [vmem:[%s2017_s2 + $0xe8] sm:$0xff] }
  0xb7   : > { %v540_v45 = vadd.f32 %v532_v57, %v508_v40  ;;  %729 = vrot.lane.b32.xlu0 %v711_v39, %s1440_s29  ;;  %v539_v57 = vadd.f32 %v1654_v56, %v507_v50  ;;  %v597_v40 = vld [vmem:[%s2017_s2 + $0x108] sm:$0xff] }
  0xb8   : > { %v1698_v43 = vpop.permute.xlu0 %706  ;;  %v645_v44 = vmul.f32 %v627_v0, %v1691_v36  ;;  %725 = vrot.lane.b32.xlu1 %v709_v42, %s1440_s29  ;;  %v710_v54 = vmul.f32 %v692_v28, %v1691_v36  ;;  %v827_v59 = vpop.permute.xlu1 %826  ;;  %v778_v28 = vmul.f32 %v767_v14, %v1743_v16  ;;  %v651_v35 = vmul.f32 %v1671_v15, %v1695_v41 }
  0xb9   : > { %v548_v47 = vmax.f32 %v540_v45, 0.0  ;;  %v547_v61 = vmax.f32 %v539_v57, 0.0  ;;  %v841_v52 = vmul.f32 %v827_v59, %v1678_v20  ;;  %v842_v18 = vmul.f32 %v827_v59, %v1675_v19  ;;  %v598_v57 = vld [vmem:[%s2017_s2 + $0x110] sm:$0xff]  ;;  %v589_v59 = vld [vmem:[%s2017_s2 + $0xc8] sm:$0xff] }
  0xba   : > { %662 = vrot.lane.b32.xlu2 %v645_v44, %s1439_s27  ;;  %v716_v39 = vmul.f32 %v1698_v43, %v1695_v41 }
  0xbb   : > { %v1705_v48 = vmul.f32 %v1663_v3, %v548_v47  ;;  %v1726_v56 = vmul.f32 %v1668_v13, %v547_v61 }
  0xbd   : > { %v649_v2 = vmul.f32 %v637_v62, %v1726_v56  ;;  %v714_v9 = vmul.f32 %v702_v7, %v1726_v56  ;;  %v779_v17 = vmul.f32 %v767_v14, %v1726_v56  ;;  %v844_v24 = vmul.f32 %v832_v23, %v1726_v56 }
  0xbe   : > { %v650_v30 = vmul.f32 %v1671_v15, %v1705_v48  ;;  %v715_v34 = vmul.f32 %v1698_v43, %v1705_v48  ;;  %v1794_v15 = vpop.permute.xlu2 %896 }
  0xbf   : > { %794 = vrot.lane.b32.xlu0 %v776_v51, %s1441_s30 }
  0xc0   : > { %v757_v55 = vpop.permute.xlu0 %756  ;;  %731 = vrot.lane.b32.xlu1 %v712_v53, %s1440_s29  ;;  %v1804_v43 = vpop.permute.xlu1 %891  ;;  %v620_v53 = vmul.f32 %v1688_v33, %v1666_v8 }
  0xc1   : > { %v774_v63 = vmul.f32 %v757_v55, %v1666_v8  ;;  %v775_v0 = vmul.f32 %v757_v55, %v1691_v36 }
  0xc2   : > { %727 = vrot.lane.b32.xlu2 %v710_v54, %s1440_s29 }
  0xc7   : > { %859 = vrot.lane.b32.xlu0 %v841_v52, %s1442_s28  ;;  %v621_v52 = vmul.f32 %v1656_v58, %v1678_v20 }
  0xc8   : > { %v1720_v1 = vpop.permute.xlu0 %771  ;;  %790 = vrot.lane.b32.xlu1 %v774_v63, %s1441_s30 }
  0xc9   : > { %v780_v38 = vmul.f32 %v1720_v1, %v1705_v48  ;;  %v781_v44 = vmul.f32 %v1720_v1, %v1695_v41  ;;  %v596_v1 = vld [vmem:[%s2017_s2 + $0x100] sm:$0xff] }
  0xca   : > { %792 = vrot.lane.b32.xlu2 %v775_v0, %s1441_s30 }
  0xcf   : > { %670 = vrot.lane.b32.xlu0 %v649_v2, %s1439_s27  ;;  %v588_v2 = vld [vmem:[%s2017_s2 + $0xc0] sm:$0xff] }
  0xd0   : > { %v822_v5 = vpop.permute.xlu0 %821  ;;  %796 = vrot.lane.b32.xlu1 %v777_v4, %s1441_s30 }
  0xd1   : > { %v840_v6 = vmul.f32 %v822_v5, %v1691_v36  ;;  %v839_v10 = vmul.f32 %v822_v5, %v1666_v8 }
  0xd3   : > { %857 = vrot.lane.b32.xlu2 %v840_v6, %s1442_s28 }
  0xd7   : > { %735 = vrot.lane.b32.xlu0 %v714_v9, %s1440_s29  ;;  %v908_v9 = vmul.f32 %v1794_v15, %v1743_v16 }
  0xd8   : > { %855 = vrot.lane.b32.xlu1 %v839_v10, %s1442_s28  ;;  %v837_v13 = vpop.permute.xlu0 %836  ;;  %v592_v10 = vld [vmem:[%s2017_s2 + $0xe0] sm:$0xff] }
  0xd9   : > { %v845_v42 = vmul.f32 %v837_v13, %v1705_v48  ;;  %v846_v47 = vmul.f32 %v837_v13, %v1695_v41 }
  0xdb   : > { %966 = vperm.xlu2 %1429, %v591_v11  }
  0xdf   : > { %800 = vrot.lane.b32.xlu0 %v779_v17, %s1441_s30 }
  0xe0   : > { %861 = vrot.lane.b32.xlu1 %v842_v18, %s1442_s28  ;;  %v1751_v22 = vpop.permute.xlu0 %886 }
  0xe1   : > { %v904_v3 = vmul.f32 %v1751_v22, %v1666_v8 }
  0xe3   : > { %668 = vrot.lane.b32.xlu2 %v648_v21, %s1439_s27 }
  0xe7   : > { %865 = vrot.lane.b32.xlu0 %v844_v24, %s1442_s28 }
  0xe8   : > { %920 = vrot.lane.b32.xlu1 %v904_v3, %s1443_s14 }
  0xeb   : > { %733 = vrot.lane.b32.xlu2 %v713_v25, %s1440_s29 }
  0xef   : > { %901 = vperm.xlu0 %1427, %v587_v26  }
  0xf0   : > { %1031 = vperm.xlu1 %1428, %v595_v27   ;;  %v622_v27 = vmul.f32 %v1658_v60, %v1743_v16 }
  0xf3   : > { %798 = vrot.lane.b32.xlu2 %v778_v28, %s1441_s30 }
  0xf7   : > { %961 = vperm.xlu0 %1427, %v590_v29  }
  0xf8   : > { %672 = vrot.lane.b32.xlu1 %v650_v30, %s1439_s27 }
  0xfb   : > { %863 = vrot.lane.b32.xlu2 %v843_v31, %s1442_s28 }
  0xff   : > { %1026 = vperm.xlu0 %1427, %v594_v32  }
 0x100   : > { %737 = vrot.lane.b32.xlu1 %v715_v34, %s1440_s29 }
 0x103   : > { %674 = vrot.lane.b32.xlu2 %v651_v35, %s1439_s27 }
 0x107   : > { %1021 = vperm.xlu0 %1427, %v593_v37  }
 0x108   : > { %802 = vrot.lane.b32.xlu1 %v780_v38, %s1441_s30 }
 0x10b   : > { %739 = vrot.lane.b32.xlu2 %v716_v39, %s1440_s29 }
 0x10f   : > { %1086 = vperm.xlu0 %1427, %v597_v40  }
 0x110   : > { %867 = vrot.lane.b32.xlu1 %v845_v42, %s1442_s28 }
 0x113   : > { %804 = vrot.lane.b32.xlu2 %v781_v44, %s1441_s30 }
 0x114   : > { %v663_v45 = vpop.permute.xlu2 %662 }
 0x118   : > { %1096 = vperm.xlu1 %1428, %v599_v46  }
 0x11a   : > { %v661_v51 = vpop.permute.xlu1 %660 }
 0x11b   : > { %869 = vrot.lane.b32.xlu2 %v846_v47, %s1442_s28  ;;  %v677_v54 = vsel %vm676_vm1, %v661_v51, %v663_v45 }
 0x11c   : > { %v728_v50 = vpop.permute.xlu2 %727  ;;  %v685_v55 = vadd.f32 %v677_v54, %v620_v53 }
 0x120   : > { %1091 = vperm.xlu1 %1428, %v598_v57  }
 0x121   : > { %v665_v61 = vpop.permute.xlu0 %664 }
 0x122   : > { %v667_v62 = vpop.permute.xlu1 %666 }
 0x123   : > { %956 = vperm.xlu2 %1429, %v589_v59   ;;  %v678_v33 = vsel %vm676_vm1, %v665_v61, %v667_v62 }
 0x124   : > { %v793_v63 = vpop.permute.xlu2 %792  ;;  %v686_v0 = vadd.f32 %v678_v33, %v621_v52 }
 0x128   : > { %1081 = vperm.xlu1 %1428, %v596_v1  }
 0x129   : > { %v730_v4 = vpop.permute.xlu0 %729 }
 0x12a   : > { %v726_v5 = vpop.permute.xlu1 %725 }
 0x12b   : > { %951 = vperm.xlu2 %1429, %v588_v2   ;;  %v742_v58 = vsel %vm741_vm2, %v726_v5, %v728_v50  ;;  %v909_v2 = vmul.f32 %v1794_v15, %v1726_v56  ;;  %v623_v5 = vmul.f32 %v1707_v49, %v1705_v48  ;;  %v906_v15 = vmul.f32 %v1804_v43, %v1678_v20 }
 0x12c   : > { %v750_v7 = vadd.f32 %v742_v58, %v685_v55  ;;  %v907_v49 = vmul.f32 %v1804_v43, %v1675_v19 }
 0x12d   : > { %v858_v6 = vpop.permute.xlu2 %857 }
 0x130   : > { %928 = vrot.lane.b32.xlu1 %v908_v9, %s1443_s14 }
 0x131   : > { %v795_v11 = vpop.permute.xlu0 %794 }
 0x132   : > { %v732_v12 = vpop.permute.xlu1 %731 }
 0x133   : > { %1016 = vperm.xlu2 %1429, %v592_v10   ;;  %v743_v13 = vsel %vm741_vm2, %v730_v4, %v732_v12 }
 0x134   : > { %v751_v17 = vadd.f32 %v743_v13, %v686_v0 }
 0x135   : > { %v967_v14 = vpop.permute.xlu2 %966 }
 0x136   : > { %v976_v18 = vmul.f32 %v967_v14, %v1695_v41 }
 0x138   : > { %999 = vrot.lane.b32.xlu1 %v976_v18, %s1444_s25 }
 0x139   : > { %v860_v21 = vpop.permute.xlu0 %859 }
 0x13a   : > { %v791_v23 = vpop.permute.xlu1 %790 }
 0x13b   : > { %v807_v24 = vsel %vm806_vm3, %v791_v23, %v793_v63 }
 0x13c   : > { %v815_v25 = vadd.f32 %v807_v24, %v750_v7 }
 0x13d   : > { %v669_v3 = vpop.permute.xlu2 %668 }
 0x141   : > { %v671_v26 = vpop.permute.xlu0 %670 }
 0x142   : > { %v679_v28 = vsel %vm676_vm1, %v669_v3, %v671_v26  ;;  %v797_v29 = vpop.permute.xlu1 %796  ;;  %v905_v26 = vmul.f32 %v1751_v22, %v1691_v36 }
 0x143   : > { %v687_v30 = vadd.f32 %v679_v28, %v622_v27  ;;  %v808_v31 = vsel %vm806_vm3, %v795_v11, %v797_v29 }
 0x144   : > { %v816_v34 = vadd.f32 %v808_v31, %v751_v17 }
 0x145   : > { %v734_v32 = vpop.permute.xlu2 %733 }
 0x149   : > { %v736_v35 = vpop.permute.xlu0 %735 }
 0x14a   : > { %v744_v37 = vsel %vm741_vm2, %v734_v32, %v736_v35  ;;  %v856_v38 = vpop.permute.xlu1 %855 }
 0x14b   : > { %v752_v39 = vadd.f32 %v744_v37, %v687_v30  ;;  %v872_v40 = vsel %vm871_vm4, %v856_v38, %v858_v6  ;;  %v975_v6 = vmul.f32 %v967_v14, %v1705_v48 }
 0x14c   : > { %v1846_v44 = vadd.f32 %v872_v40, %v815_v25 }
 0x14d   : > { %v799_v42 = vpop.permute.xlu2 %798 }
 0x151   : > { %v801_v60 = vpop.permute.xlu0 %800 }
 0x152   : > { %v809_v45 = vsel %vm806_vm3, %v799_v42, %v801_v60  ;;  %v862_v46 = vpop.permute.xlu1 %861 }
 0x153   : > { %v817_v47 = vadd.f32 %v809_v45, %v752_v39  ;;  %v873_v50 = vsel %vm871_vm4, %v860_v21, %v862_v46 }
 0x154   : > { %v1850_v53 = vadd.f32 %v873_v50, %v816_v34  ;;  %v1147_v50 = vld [vmem:[%s2022_s7 + $0x18] sm:$0xff] }
 0x155   : > { %v864_v51 = vpop.permute.xlu2 %863 }
 0x159   : > { %v866_v54 = vpop.permute.xlu0 %865 }
 0x15a   : > { %v874_v55 = vsel %vm871_vm4, %v864_v51, %v866_v54  ;;  %v1853_v57 = vpop.permute.xlu1 %920 }
 0x15b   : > { %v1855_v59 = vadd.f32 %v874_v55, %v817_v47 }
 0x15d   : > { %v675_v61 = vpop.permute.xlu2 %674 }
 0x161   : > { %v902_v52 = vpop.permute.xlu0 %901 }
 0x162   : > { %v910_v62 = vmul.f32 %v902_v52, %v1705_v48  ;;  %v911_v63 = vmul.f32 %v902_v52, %v1695_v41  ;;  %v1032_v33 = vpop.permute.xlu1 %1031  ;;  %v1146_v52 = vld [vmem:[%s2022_s7 + $0x10] sm:$0xff] }
 0x163   : > { %v1041_v11 = vmul.f32 %v1032_v33, %v1695_v41  ;;  %v1040_v23 = vmul.f32 %v1032_v33, %v1705_v48  ;;  %v1174_v33 = vld [vmem:[%s2023_s8 + $0x10] sm:$0xff] }
 0x164   : > { %934 = vrot.lane.b32.xlu0 %v911_v63, %s1443_s14  ;;  %932 = vrot.lane.b32.xlu2 %v910_v62, %s1443_s14  ;;  %v1175_v62 = vld [vmem:[%s2023_s8 + $0x18] sm:$0xff] }
 0x165   : > { %v740_v0 = vpop.permute.xlu2 %739 }
 0x169   : > { %v962_v1 = vpop.permute.xlu0 %961 }
 0x16a   : > { %v973_v4 = vmul.f32 %v962_v1, %v1743_v16  ;;  %v673_v58 = vpop.permute.xlu1 %672  ;;  %v974_v18 = vmul.f32 %v962_v1, %v1726_v56  ;;  %v1172_v1 = vld [vmem:[%s2023_s8] sm:$0xff] }
 0x16b   : > { %v680_v7 = vsel %vm676_vm1, %v673_v58, %v675_v61 }
 0x16c   : > { %v688_v10 = vadd.f32 %v680_v7, %v623_v5  ;;  %930 = vrot.lane.b32.xlu2 %v909_v2, %s1443_s14  ;;  %993 = vrot.lane.b32.xlu1 %v973_v4, %s1444_s25  ;;  %v1251_v7 = vld [vmem:[%s2024_s9 + $0x8] sm:$0xff] }
 0x16d   : > { %v805_v9 = vpop.permute.xlu2 %804  ;;  %997 = vrot.lane.b32.xlu0 %v975_v6, %s1444_s25  ;;  %v1250_v6 = vld [vmem:[%s2024_s9] sm:$0xff] }
 0x171   : > { %v1027_v31 = vpop.permute.xlu0 %1026 }
 0x172   : > { %v738_v12 = vpop.permute.xlu1 %737  ;;  %v1038_v32 = vmul.f32 %v1027_v31, %v1743_v16  ;;  %v1039_v35 = vmul.f32 %v1027_v31, %v1726_v56 }
 0x173   : > { %v745_v13 = vsel %vm741_vm2, %v738_v12, %v740_v0 }
 0x174   : > { %v753_v17 = vadd.f32 %v745_v13, %v688_v10  ;;  %924 = vrot.lane.b32.xlu2 %v906_v15, %s1443_s14  ;;  %1064 = vrot.lane.b32.xlu1 %v1041_v11, %s1445_s26  ;;  %v1278_v15 = vld [vmem:[%s2025_s10] sm:$0xff]  ;;  %v1279_v11 = vld [vmem:[%s2025_s10 + $0x8] sm:$0xff] }
 0x175   : > { %v870_v14 = vpop.permute.xlu2 %869  ;;  %926 = vrot.lane.b32.xlu0 %v907_v49, %s1443_s14 }
 0x17a   : > { %v803_v21 = vpop.permute.xlu1 %802 }
 0x17b   : > { %v810_v24 = vsel %vm806_vm3, %v803_v21, %v805_v9  ;;  %v1252_v9 = vld [vmem:[%s2024_s9 + $0x10] sm:$0xff] }
 0x17c   : > { %v818_v43 = vadd.f32 %v810_v24, %v753_v17  ;;  %995 = vrot.lane.b32.xlu2 %v974_v18, %s1444_s25  ;;  %v1281_v18 = vld [vmem:[%s2025_s10 + $0x18] sm:$0xff] }
 0x17d   : > { %v957_v3 = vpop.permute.xlu2 %956  ;;  %1062 = vrot.lane.b32.xlu0 %v1040_v23, %s1445_s26 }
 0x17e   : > { %v972_v25 = vmul.f32 %v957_v3, %v1675_v19  ;;  %v971_v28 = vmul.f32 %v957_v3, %v1678_v20 }
 0x180   : > { %991 = vrot.lane.b32.xlu1 %v972_v25, %s1444_s25 }
 0x182   : > { %v868_v27 = vpop.permute.xlu1 %867 }
 0x183   : > { %v875_v29 = vsel %vm871_vm4, %v868_v27, %v870_v14  ;;  %v1280_v14 = vld [vmem:[%s2025_s10 + $0x10] sm:$0xff] }
 0x184   : > { %v1891_v30 = vadd.f32 %v875_v29, %v818_v43  ;;  %922 = vrot.lane.b32.xlu2 %v905_v26, %s1443_s14 }
 0x185   : > { %989 = vrot.lane.b32.xlu0 %v971_v28, %s1444_s25  ;;  %v952_v22 = vpop.permute.xlu2 %951 }
 0x186   : > { %v969_v39 = vmul.f32 %v952_v22, %v1666_v8  ;;  %v970_v40 = vmul.f32 %v952_v22, %v1691_v36 }
 0x18a   : > { %v1097_v34 = vpop.permute.xlu1 %1096 }
 0x18b   : > { %v1105_v37 = vmul.f32 %v1097_v34, %v1705_v48  ;;  %v1106_v38 = vmul.f32 %v1097_v34, %v1695_v41  ;;  %v1022_v48 = vpop.permute.xlu0 %1021 }
 0x18c   : > { %1058 = vrot.lane.b32.xlu2 %v1038_v32, %s1445_s26  ;;  %v1036_v60 = vmul.f32 %v1022_v48, %v1678_v20  ;;  %v1037_v45 = vmul.f32 %v1022_v48, %v1675_v19 }
 0x18d   : > { %1060 = vrot.lane.b32.xlu0 %v1039_v35, %s1445_s26  ;;  %1127 = vrot.lane.b32.xlu1 %v1105_v37, %s1446_s12  ;;  %v1017_v41 = vpop.permute.xlu2 %1016 }
 0x18e   : > { %v1034_v51 = vmul.f32 %v1017_v41, %v1666_v8  ;;  %v1035_v54 = vmul.f32 %v1017_v41, %v1691_v36 }
 0x192   : > { %v1092_v42 = vpop.permute.xlu1 %1091 }
 0x193   : > { %v1103_v46 = vmul.f32 %v1092_v42, %v1743_v16  ;;  %v1104_v47 = vmul.f32 %v1092_v42, %v1726_v56  ;;  %v1087_v16 = vpop.permute.xlu0 %1086 }
 0x194   : > { %1129 = vrot.lane.b32.xlu2 %v1106_v38, %s1446_s12  ;;  %v1101_v55 = vmul.f32 %v1087_v16, %v1678_v20  ;;  %v1102_v61 = vmul.f32 %v1087_v16, %v1675_v19  ;;  %v1145_v20 = vld [vmem:[%s2022_s7 + $0x8] sm:$0xff] }
 0x195   : > { %985 = vrot.lane.b32.xlu0 %v969_v39, %s1444_s25  ;;  %987 = vrot.lane.b32.xlu1 %v970_v40, %s1444_s25 }
 0x19a   : > { %v1082_v56 = vpop.permute.xlu1 %1081 }
 0x19b   : > { %v1099_v63 = vmul.f32 %v1082_v56, %v1666_v8  ;;  %v1100_v19 = vmul.f32 %v1082_v56, %v1691_v36  ;;  %v1144_v8 = vld [vmem:[%s2022_s7] sm:$0xff]  ;;  %v1173_v36 = vld [vmem:[%s2023_s8 + $0x8] sm:$0xff] }
 0x19c   : > { %1054 = vrot.lane.b32.xlu2 %v1036_v60, %s1445_s26 }
 0x19d   : > { %1056 = vrot.lane.b32.xlu0 %v1037_v45, %s1445_s26  ;;  %1123 = vrot.lane.b32.xlu1 %v1103_v46, %s1446_s12 }
 0x1a2   : > { %v929_v2 = vpop.permute.xlu1 %928 }
 0x1a4   : > { %1125 = vrot.lane.b32.xlu2 %v1104_v47, %s1446_s12 }
 0x1a5   : > { %1165 = vperm.xlu0 %1427, %v1147_v50   ;;  %1050 = vrot.lane.b32.xlu1 %v1034_v51, %s1445_s26 }
 0x1aa   : > { %v1000_v21 = vpop.permute.xlu1 %999 }
 0x1ac   : > { %1052 = vrot.lane.b32.xlu2 %v1035_v54, %s1445_s26 }
 0x1ad   : > { %1119 = vrot.lane.b32.xlu0 %v1101_v55, %s1446_s12  ;;  %1121 = vrot.lane.b32.xlu1 %v1102_v61, %s1446_s12 }
 0x1b4   : > { %1160 = vperm.xlu2 %1429, %v1146_v52  }
 0x1b5   : > { %1193 = vperm.xlu0 %1427, %v1175_v62   ;;  %1115 = vrot.lane.b32.xlu1 %v1099_v63, %s1446_s12 }
 0x1bc   : > { %1117 = vrot.lane.b32.xlu2 %v1100_v19, %s1446_s12 }
 0x1bd   : > { %1155 = vperm.xlu0 %1427, %v1145_v20   ;;  %1188 = vperm.xlu1 %1428, %v1174_v33  }
 0x1be   : > { %v933_v0 = vpop.permute.xlu2 %932 }
 0x1c4   : > { %1150 = vperm.xlu2 %1429, %v1144_v8  }
 0x1c5   : > { %1183 = vperm.xlu0 %1427, %v1173_v36   ;;  %1178 = vperm.xlu1 %1428, %v1172_v1  }
 0x1c6   : > { %v931_v4 = vpop.permute.xlu2 %930 }
 0x1c7   : > { %v939_v5 = vsel %vm936_vm5, %v929_v2, %v931_v4 }
 0x1c8   : > { %v947_v58 = vadd.f32 %v939_v5, %v1855_v59  ;;  %v1253_v59 = vld [vmem:[%s2024_s9 + $0x18] sm:$0xff] }
 0x1cc   : > { %1256 = vperm.xlu2 %1429, %v1250_v6  }
 0x1cd   : > { %1261 = vperm.xlu0 %1427, %v1251_v7   ;;  %1266 = vperm.xlu1 %1428, %v1252_v9  }
 0x1ce   : > { %v925_v10 = vpop.permute.xlu2 %924 }
 0x1d4   : > { %1271 = vperm.xlu2 %1429, %v1253_v59  }
 0x1d5   : > { %1284 = vperm.xlu0 %1427, %v1278_v15   ;;  %1289 = vperm.xlu1 %1428, %v1279_v11  }
 0x1d6   : > { %v935_v12 = vpop.permute.xlu0 %934  ;;  %v996_v17 = vpop.permute.xlu2 %995 }
 0x1d7   : > { %v940_v49 = vsel %vm936_vm5, %v933_v0, %v935_v12 }
 0x1d8   : > { %v948_v13 = vadd.f32 %v940_v49, %v1891_v30 }
 0x1dc   : > { %1294 = vperm.xlu2 %1429, %v1280_v14  }
 0x1dd   : > { %1299 = vperm.xlu0 %1427, %v1281_v18  }
 0x1de   : > { %v923_v24 = vpop.permute.xlu2 %922  ;;  %v994_v3 = vpop.permute.xlu1 %993 }
 0x1df   : > { %v998_v23 = vpop.permute.xlu0 %997  ;;  %v1004_v55 = vsel %vm1001_vm6, %v994_v3, %v996_v17  ;;  %v937_v8 = vsel %vm936_vm5, %v1853_v57, %v923_v24 }
 0x1e0   : > { %v1012_v52 = vadd.f32 %v1004_v55, %v947_v58  ;;  %v945_v5 = vadd.f32 %v937_v8, %v1846_v44 }
 0x1e6   : > { %v1059_v27 = vpop.permute.xlu2 %1058  ;;  %v1065_v28 = vpop.permute.xlu1 %1064 }
 0x1e7   : > { %v927_v43 = vpop.permute.xlu0 %926 }
 0x1e8   : > { %v938_v25 = vsel %vm936_vm5, %v925_v10, %v927_v43 }
 0x1e9   : > { %v946_v26 = vadd.f32 %v938_v25, %v1850_v53  ;;  %v1005_v53 = vsel %vm1001_vm6, %v998_v23, %v1000_v21 }
 0x1ea   : > { %v1013_v50 = vadd.f32 %v1005_v53, %v948_v13 }
 0x1ee   : > { %v1130_v32 = vpop.permute.xlu2 %1129 }
 0x1ef   : > { %v1063_v29 = vpop.permute.xlu0 %1062 }
 0x1f0   : > { %v1070_v46 = vsel %vm1066_vm7, %v1063_v29, %v1065_v28 }
 0x1f1   : > { %v1078_v54 = vadd.f32 %v1070_v46, %v1013_v50 }
 0x1f2   : > { %v992_v30 = vpop.permute.xlu1 %991 }
 0x1f6   : > { %v1055_v37 = vpop.permute.xlu2 %1054 }
 0x1f7   : > { %v990_v31 = vpop.permute.xlu0 %989 }
 0x1f8   : > { %v1003_v58 = vsel %vm1001_vm6, %v990_v31, %v992_v30  ;;  %v1205_v30 = vld [vmem:[%s2018_s3 + $0x8] sm:$0xff]  ;;  %v1206_v31 = vld [vmem:[%s2018_s3 + $0x10] sm:$0xff] }
 0x1f9   : > { %v1011_v11 = vadd.f32 %v1003_v58, %v946_v26  ;;  %v1204_v26 = vld [vmem:[%s2018_s3] sm:$0xff] }
 0x1fe   : > { %v1126_v39 = vpop.permute.xlu2 %1125 }
 0x1ff   : > { %v1061_v34 = vpop.permute.xlu0 %1060  ;;  %v1128_v35 = vpop.permute.xlu1 %1127 }
 0x200   : > { %v1135_v51 = vsel %vm1131_vm8, %v1128_v35, %v1130_v32  ;;  %v1069_v56 = vsel %vm1066_vm7, %v1059_v27, %v1061_v34  ;;  %v1207_v32 = vld [vmem:[%s2018_s3 + $0x18] sm:$0xff] }
 0x201   : > { %v1143_v61 = vadd.f32 %v1135_v51, %v1078_v54  ;;  %v1077_v33 = vadd.f32 %v1069_v56, %v1012_v52 }
 0x206   : > { %v1053_v42 = vpop.permute.xlu2 %1052 }
 0x207   : > { %v986_v22 = vpop.permute.xlu0 %985  ;;  %v988_v38 = vpop.permute.xlu1 %987 }
 0x208   : > { %v1002_v2 = vsel %vm1001_vm6, %v986_v22, %v988_v38 }
 0x209   : > { %v1010_v7 = vadd.f32 %v1002_v2, %v945_v5 }
 0x20e   : > { %v1161_v16 = vpop.permute.xlu2 %1160 }
 0x20f   : > { %v1057_v40 = vpop.permute.xlu0 %1056  ;;  %v1124_v48 = vpop.permute.xlu1 %1123 }
 0x210   : > { %v1134_v63 = vsel %vm1131_vm8, %v1124_v48, %v1126_v39  ;;  %v1068_v10 = vsel %vm1066_vm7, %v1055_v37, %v1057_v40 }
 0x211   : > { %v1142_v36 = vadd.f32 %v1134_v63, %v1077_v33  ;;  %v1076_v14 = vadd.f32 %v1068_v10, %v1011_v11 }
 0x213   : > { %v1170_v9 = vmul.f32 %v1161_v16, %v1142_v36 }
 0x216   : > { %v1118_v4 = vpop.permute.xlu2 %1117 }
 0x217   : > { %v1166_v60 = vpop.permute.xlu0 %1165  ;;  %v1051_v45 = vpop.permute.xlu1 %1050 }
 0x218   : > { %v1171_v62 = vmul.f32 %v1166_v60, %v1143_v61  ;;  %v1067_v6 = vsel %vm1066_vm7, %v1051_v45, %v1053_v42 }
 0x219   : > { %v1075_v12 = vadd.f32 %v1067_v6, %v1010_v7 }
 0x21e   : > { %v1151_v21 = vpop.permute.xlu2 %1150 }
 0x21f   : > { %v1120_v41 = vpop.permute.xlu0 %1119  ;;  %v1122_v47 = vpop.permute.xlu1 %1121 }
 0x220   : > { %v1133_v13 = vsel %vm1131_vm8, %v1120_v41, %v1122_v47 }
 0x221   : > { %v1141_v18 = vadd.f32 %v1133_v13, %v1076_v14 }
 0x226   : > { %v1257_v35 = vpop.permute.xlu2 %1256 }
 0x227   : > { %v1194_v19 = vpop.permute.xlu0 %1193  ;;  %v1116_v20 = vpop.permute.xlu1 %1115 }
 0x228   : > { %v1199_v0 = vadd.f32 %v1194_v19, %v1171_v62  ;;  %v1132_v59 = vsel %vm1131_vm8, %v1116_v20, %v1118_v4 }
 0x229   : > { %v1140_v44 = vadd.f32 %v1132_v59, %v1075_v12 }
 0x22a   : > { %v1203_v1 = vmax.f32 %v1199_v0, 0.0 }
 0x22b   : > { %v1168_v24 = vmul.f32 %v1151_v21, %v1140_v44 }
 0x22c   : > { %1233 = vmatpush.msra.mxu2 %v1203_v1 }
 0x22e   : > { %v1272_v42 = vpop.permute.xlu2 %1271 }
 0x22f   : > { %v1156_v15 = vpop.permute.xlu0 %1155  ;;  %v1189_v57 = vpop.permute.xlu1 %1188 }
 0x230   : > { %v1198_v49 = vadd.f32 %v1189_v57, %v1170_v9  ;;  %v1169_v23 = vmul.f32 %v1156_v15, %v1141_v18 }
 0x232   : > { %v1202_v17 = vmax.f32 %v1198_v49, 0.0 }
 0x234   : > { %1234 = vmatpush.msra.mxu2 %v1202_v17 }
 0x236   : > { %v1295_v51 = vpop.permute.xlu2 %1294 }
 0x237   : > { %v1184_v3 = vpop.permute.xlu0 %1183  ;;  %v1179_v43 = vpop.permute.xlu1 %1178 }
 0x238   : > { %v1197_v25 = vadd.f32 %v1184_v3, %v1169_v23  ;;  %v1196_v27 = vadd.f32 %v1179_v43, %v1168_v24 }
 0x23a   : > { %v1201_v28 = vmax.f32 %v1197_v25, 0.0  ;;  %v1200_v29 = vmax.f32 %v1196_v27, 0.0 }
 0x23c   : > { %1235 = vmatpush.msra.mxu2 %v1201_v28 }
 0x23e   : > { %1236 = vmatpush.msra.mxu2 %v1200_v29 }
 0x23f   : > { %1386 = vmatmul.msk.f32.vlgmr.msra.gmra.mxu2 %vm1208_vm9, %v1204_v26  ;;  %v1262_v34 = vpop.permute.xlu0 %1261  ;;  %v1267_v37 = vpop.permute.xlu1 %1266 }
 0x247   : > { %1387 = vmatmul.msk.f32.gmra.mxu2 %vm1208_vm9, %v1205_v30  ;;  %v1285_v39 = vpop.permute.xlu0 %1284  ;;  %v1290_v53 = vpop.permute.xlu1 %1289 }
 0x24f   : > { %1388 = vmatmul.msk.f32.gmra.mxu2 %vm1208_vm9, %v1206_v31  ;;  %v1300_v56 = vpop.permute.xlu0 %1299 }
 0x257   : > { %1389 = vmatmul.msk.f32.gmra.mxu2 %vm1208_vm9, %v1207_v32 }
 0x2c2   : > { %v1238_v22 = vpop.f32.mrf.mxu2 }
 0x2c3   : > { %v1274_v38 = vmul.f32 %v1257_v35, %v1238_v22 }
 0x2c5   : > { %v1302_v40 = vadd.f32 %v1285_v39, %v1274_v38 }
 0x2c7   : > { %v1306_v48 = vmax.f32 %v1302_v40, 0.0 }
 0x2c9   : > { %1310 = vst [vmem:[%s386_s20] sm:$0xff] %v1306_v48 }
 0x2ca   : > { %v1241_v60 = vpop.f32.mrf.mxu2 }
 0x2cb   : > { %v1275_v45 = vmul.f32 %v1262_v34, %v1241_v60 }
 0x2cd   : > { %v1303_v46 = vadd.f32 %v1290_v53, %v1275_v45 }
 0x2cf   : > { %v1307_v41 = vmax.f32 %v1303_v46, 0.0 }
 0x2d1   : > { %1311 = vst [vmem:[%s386_s20 + $0x8] sm:$0xff] %v1307_v41 }
 0x2d2   : > { %v1244_v47 = vpop.f32.mrf.mxu2 }
 0x2d3   : > { %v1276_v50 = vmul.f32 %v1267_v37, %v1244_v47 }
 0x2d5   : > { %v1304_v16 = vadd.f32 %v1295_v51, %v1276_v50 }
 0x2d7   : > { %v1308_v54 = vmax.f32 %v1304_v16, 0.0 }
 0x2d9   : > { %1312 = vst [vmem:[%s386_s20 + $0x10] sm:$0xff] %v1308_v54 }
 0x2da   : > { %v1247_v55 = vpop.f32.mrf.mxu2 }
 0x2db   : > { %v1277_v61 = vmul.f32 %v1272_v42, %v1247_v55 }
 0x2dd   : > { %v1305_v52 = vadd.f32 %v1300_v56, %v1277_v61 }
 0x2df   : > { %v1309_v62 = vmax.f32 %v1305_v52, 0.0 }
 0x2e1   : > { %1313 = vst [vmem:[%s386_s20 + $0x18] sm:$0xff] %v1309_v62 }
 0x2e2 PF: > { %s21_s17 = sadd.s32 1, %s1436_s17  }
 0x2e3   : > { %p18_p4 = scmp.ge.s32.totalorder %s21_s17, 4  }
 0x2e5   :  { %20 = sbr.rel (!%p18_p4) target bundleno = 1 (0x1), region = 94 }

</bundles_post_ra>
